<compile_context>
chip_gen: v7x
topology: tpu7x:2x2x1
jax: 0.10.0
libtpu: 0.0.40
codegen_flags: <defaults>
</compile_context>

<pallas_src>
import functools
import itertools
import math

import jax
import jax.numpy as jnp
import numpy as np
from jax.experimental import pallas as pl
from jax.experimental.pallas import tpu as pltpu


def _round_up(x, m):
    return (x + m - 1) // m * m


def _pad_cols(o):
    # 256-aligned output tiles fully feed the 256-wide MXU on v6e/v7x once
    # O >= 256; 128 alignment is already optimal for smaller O (and on v5e).
    return _round_up(o, 256) if o >= 256 else _round_up(o, 128)


def attention_net_kernel(x_ref, a_ref, c_ref, d_ref, b2_ref, sel_ref, out_ref):
    x = x_ref[...]                                                    # (TB, N) bf16, exact 0/1

    # Folded linear1 + key projection:  s = x @ (W1^T @ key) + (b1 @ key)
    s = jnp.dot(x, a_ref[...], preferred_element_type=jnp.float32) + c_ref[...]

    # softmax(dim=1), numerically stable; denominator on the EUP.
    s = s - jnp.max(s, axis=1, keepdims=True)
    e = jnp.exp(s)
    p = e * pl.reciprocal(jnp.sum(e, axis=1, keepdims=True), approx=True)

    # Folded value projection + linear2:  y = p @ (value @ W2^T) + b2
    y = jnp.dot(p.astype(jnp.bfloat16), d_ref[...],
                preferred_element_type=jnp.float32) + b2_ref[...]     # (TB, O_pad) f32

    # Pair mask from ONE selector matmul: xsum in {0,1,2};
    # xsum*(xsum-1)/2 == 1 iff both items of the pair are present.
    xsum = jnp.dot(x, sel_ref[...], preferred_element_type=jnp.float32)
    mask = xsum * (xsum - 1.0) * 0.5

    out_ref[...] = y * mask


def attention_net_forward(x, w1, b1, key_m, val_m, w2, b2, sel, *, block_b=256):
    """x: (B, N) 0/1 float.  w1: (Q, N), b1: (1, Q), key_m: (Q, K), val_m: (K, F),
    w2: (O, F), b2: (1, O).  sel: (N, O_pad) pair-sum selector (two ones per column)."""
    B, N = x.shape
    K = key_m.shape[1]
    O = w2.shape[0]
    O_pad = sel.shape[1]

    # ---- offline weight folding (exact algebra, done once outside the kernel) ----
    a_f = w1.T.astype(jnp.float32) @ key_m.astype(jnp.float32)               # (N, K)
    c_f = b1.reshape(1, -1).astype(jnp.float32) @ key_m.astype(jnp.float32)  # (1, K)
    d_f = val_m.astype(jnp.float32) @ w2.T.astype(jnp.float32)               # (K, O)
    a_bf = a_f.astype(jnp.bfloat16)
    d_bf = jnp.zeros((K, O_pad), jnp.bfloat16).at[:, :O].set(d_f.astype(jnp.bfloat16))
    b2_p = jnp.zeros((1, O_pad), jnp.float32).at[:, :O].set(b2.reshape(1, O))
    sel_bf = sel.astype(jnp.bfloat16)                                        # 0/1, exact in bf16

    # ---- batch tiling: multiples of 16 (bf16 sublanes); >=2 grid steps when possible
    # so dimension_semantics=("parallel",) can shard across v7x's 2 TensorCores.
    B_pad = _round_up(B, 16)
    TB = min(block_b, B_pad)
    if B_pad // TB < 2 and B_pad >= 32:
        TB = _round_up(B_pad, 32) // 2        # two equal tiles, multiple of 16
        B_pad = 2 * TB
    else:
        B_pad = _round_up(B_pad, TB)
    nb = B_pad // TB

    x_p = jnp.zeros((B_pad, N), jnp.bfloat16).at[:B].set(x.astype(jnp.bfloat16))

    flops = 2 * B_pad * (N * K + K * O_pad + N * O_pad)
    bytes_accessed = sum(int(a.size) * a.dtype.itemsize
                         for a in (x_p, a_bf, c_f, d_bf, b2_p, sel_bf))
    bytes_accessed += B_pad * O_pad * 4
    cost = pl.CostEstimate(flops=int(flops), transcendentals=int(B_pad * (K + 1)),
                           bytes_accessed=int(bytes_accessed))

    # Generation-aware VMEM limit: 75% of physical VMEM (leaves headroom for
    # compiler scratch / double-buffers; ~48 MiB on v7x, ~96 MiB on v5e/v6e).
    try:
        vmem_limit = int(pltpu.get_tpu_info().vmem_capacity_bytes) * 3 // 4
    except Exception:
        vmem_limit = None   # keep the compiler's default scoped limit

    def build(weight_pipeline_mode):
        kw = ({} if weight_pipeline_mode is None
              else {"pipeline_mode": weight_pipeline_mode})

        def resident(shape):
            # Constant block index across the whole grid -> weights stay in VMEM.
            return pl.BlockSpec(shape, lambda i: (0, 0), **kw)

        return pl.pallas_call(
            attention_net_kernel,
            out_shape=jax.ShapeDtypeStruct((B_pad, O_pad), jnp.float32),
            grid=(nb,),
            in_specs=[
                pl.BlockSpec((TB, N), lambda i: (i, 0)),   # x: tiled over batch
                resident((N, K)),                          # A = W1^T @ key
                resident((1, K)),                          # c = b1 @ key
                resident((K, O_pad)),                      # D = value @ W2^T (padded)
                resident((1, O_pad)),                      # b2 (padded)
                resident((N, O_pad)),                      # pair-sum selector
            ],
            out_specs=pl.BlockSpec((TB, O_pad), lambda i: (i, 0)),
            compiler_params=pltpu.CompilerParams(
                dimension_semantics=("parallel",),
                vmem_limit_bytes=vmem_limit),
            cost_estimate=cost,
        )

    args = (x_p, a_bf, c_f, d_bf, b2_p, sel_bf)
    buffered = getattr(pl, "Buffered", None)
    if buffered is None:
        out = build(None)(*args)
    else:
        try:
            # Single-buffer the constant-index resident weights.
            out = build(buffered(1))(*args)
        except Exception:
            out = build(None)(*args)

    return out[:B, :O]


def make_params(key, item_number, query_dim, key_dim, feature_dim, output_dim):
    """Deterministic parameter init mirroring the module's __init__ shapes."""
    ks = jax.random.split(key, 6)

    def xavier_uniform(k, fan_out, fan_in):
        limit = math.sqrt(6.0 / (fan_in + fan_out))
        return jax.random.uniform(k, (fan_out, fan_in), jnp.float32, -limit, limit)

    w1 = xavier_uniform(ks[0], query_dim, item_number)       # (Q, N) torch (out, in)
    b1 = jax.random.normal(ks[1], (1, query_dim), jnp.float32)
    key_m = jax.random.normal(ks[2], (query_dim, key_dim), jnp.float32)
    val_m = jax.random.normal(ks[3], (key_dim, feature_dim), jnp.float32)
    w2 = xavier_uniform(ks[4], output_dim, feature_dim)      # (O, F)
    b2 = jax.random.normal(ks[5], (1, output_dim), jnp.float32)
    return w1, b1, key_m, val_m, w2, b2


def make_pair_selection(item_number, o_pad):
    """Single pair-sum selector: column p has ones at rows i and j of pair p, so
    (x @ sel)[:, p] = x[:, i] + x[:, j] in {0,1,2}. Columns [O, o_pad) are zero
    (mask 0 in the pad region)."""
    # TODO(synk): for item_number >~ 300 replace this ~N^3/2-byte selector with an
    # in-kernel lane gather (jnp.take on int32 pair indices) to stay inside VMEM.
    com_list = list(itertools.combinations(range(item_number), 2))
    O = len(com_list)
    i_idx = np.array([c[0] for c in com_list], np.int32)
    j_idx = np.array([c[1] for c in com_list], np.int32)
    sel = np.zeros((item_number, o_pad), np.float32)
    sel[i_idx, np.arange(O)] = 1.0
    sel[j_idx, np.arange(O)] = 1.0
    return jnp.asarray(sel), jnp.asarray(i_idx), jnp.asarray(j_idx)


def reference_forward(x, w1, b1, key_m, val_m, w2, b2, i_idx, j_idx):
    """Pure-JAX f32 replica of the PyTorch forward."""
    h = x @ w1.T + b1
    s = h @ key_m
    p = jax.nn.softmax(s, axis=1)
    v = p @ val_m
    y = v @ w2.T + b2
    mask = x[:, i_idx] * x[:, j_idx]          # exact: x is 0/1
    return y * mask


if __name__ == "__main__":
    # Small, forward-consistent shapes: item_number=16 -> output_dim = 16*15/2 = 120
    B = 8
    item_number = 16
    query_dim, key_dim, feature_dim = 5, 10, 8
    output_dim = item_number * (item_number - 1) // 2
    o_pad = _pad_cols(output_dim)

    root = jax.random.PRNGKey(0)
    k_x, k_p = jax.random.split(root)

    # Multi-hot binary input (matches what get_mask expects)
    x = jax.random.bernoulli(k_x, 0.5, (B, item_number)).astype(jnp.float32)

    w1, b1, key_m, val_m, w2, b2 = make_params(
        k_p, item_number, query_dim, key_dim, feature_dim, output_dim)
    sel, i_idx, j_idx = make_pair_selection(item_number, o_pad)

    out = attention_net_forward(x, w1, b1, key_m, val_m, w2, b2, sel)
    out = jax.block_until_ready(out)

    ref = reference_forward(x, w1, b1, key_m, val_m, w2, b2, i_idx, j_idx)
    assert out.shape == (B, output_dim)
    # Kernel folds the weight-only chains and uses bf16 MXU operands + approx
    # reciprocal; tolerance covers that vs. the plain-f32 module math.
    assert jnp.allclose(out, ref, atol=5e-2, rtol=5e-2), "mismatch vs reference"

    print("KERNEL_OK")
</pallas_src>

<mosaic_0001>
module attributes {stable_mosaic.version = 11 : i64} {
  func.func @attention_net_kernel(%arg0: i32, %arg1: memref<16x16xbf16, #tpu.memory_space<vmem>>, %arg2: memref<16x10xbf16, #tpu.memory_space<vmem>>, %arg3: memref<1x10xf32, #tpu.memory_space<vmem>>, %arg4: memref<10x128xbf16, #tpu.memory_space<vmem>>, %arg5: memref<1x128xf32, #tpu.memory_space<vmem>>, %arg6: memref<16x128xbf16, #tpu.memory_space<vmem>>, %arg7: memref<16x128xf32, #tpu.memory_space<vmem>>) attributes {dimension_semantics = [#tpu.dimension_semantics<parallel>], iteration_bounds = array<i64: 1>, scalar_prefetch = 0 : i64, scratch_operands = 0 : i64, tpu.core_type = #tpu.core_type<tc>, window_params = [{transform_indices = @transform_0, window_bounds = array<i64: 16, 16>}, {pipeline_mode = #tpu.pipeline_mode<synchronous>, transform_indices = @transform_1, window_bounds = array<i64: 16, 10>}, {pipeline_mode = #tpu.pipeline_mode<synchronous>, transform_indices = @transform_2, window_bounds = array<i64: 1, 10>}, {pipeline_mode = #tpu.pipeline_mode<synchronous>, transform_indices = @transform_3, window_bounds = array<i64: 10, 128>}, {pipeline_mode = #tpu.pipeline_mode<synchronous>, transform_indices = @transform_4, window_bounds = array<i64: 1, 128>}, {pipeline_mode = #tpu.pipeline_mode<synchronous>, transform_indices = @transform_5, window_bounds = array<i64: 16, 128>}, {transform_indices = @transform_6, window_bounds = array<i64: 16, 128>}]} {
    %c0 = arith.constant 0 : index
    %c0_0 = arith.constant 0 : index
    %0 = vector.load %arg1[%c0, %c0_0] : memref<16x16xbf16, #tpu.memory_space<vmem>>, vector<16x16xbf16>
    %c0_1 = arith.constant 0 : index
    %c0_2 = arith.constant 0 : index
    %1 = vector.load %arg2[%c0_1, %c0_2] : memref<16x10xbf16, #tpu.memory_space<vmem>>, vector<16x10xbf16>
    %cst = arith.constant dense<0.000000e+00> : vector<16x10xf32>
    %2 = tpu.matmul %0, %1, %cst {dimension_numbers = #tpu.dot_dimension_numbers<[1], [0], [0], [1], [0, 0, 1, 1], [], []>} : vector<16x16xbf16>, vector<16x10xbf16>, vector<16x10xf32> -> vector<16x10xf32>
    %c0_3 = arith.constant 0 : index
    %c0_4 = arith.constant 0 : index
    %3 = vector.load %arg3[%c0_3, %c0_4] : memref<1x10xf32, #tpu.memory_space<vmem>>, vector<1x10xf32>
    %4 = vector.broadcast %3 : vector<1x10xf32> to vector<16x10xf32>
    %5 = arith.addf %2, %4 : vector<16x10xf32>
    %cst_5 = arith.constant dense<0xFF800000> : vector<16xf32>
    %6 = vector.multi_reduction <maximumf>, %5, %cst_5 [1] : vector<16x10xf32> to vector<16xf32>
    %7 = vector.shape_cast %6 : vector<16xf32> to vector<16x1xf32>
    %8 = vector.broadcast %7 : vector<16x1xf32> to vector<16x10xf32>
    %9 = arith.subf %5, %8 : vector<16x10xf32>
    %10 = math.exp %9 : vector<16x10xf32>
    %cst_6 = arith.constant dense<0.000000e+00> : vector<16xf32>
    %11 = vector.multi_reduction <add>, %10, %cst_6 [1] : vector<16x10xf32> to vector<16xf32>
    %12 = vector.shape_cast %11 : vector<16xf32> to vector<16x1xf32>
    %13 = tpu.reciprocal %12 {approx = true} : vector<16x1xf32> -> vector<16x1xf32>
    %14 = vector.broadcast %13 : vector<16x1xf32> to vector<16x10xf32>
    %15 = arith.mulf %10, %14 : vector<16x10xf32>
    %16 = arith.truncf %15 : vector<16x10xf32> to vector<16x10xbf16>
    %c0_7 = arith.constant 0 : index
    %c0_8 = arith.constant 0 : index
    %17 = vector.load %arg4[%c0_7, %c0_8] : memref<10x128xbf16, #tpu.memory_space<vmem>>, vector<10x128xbf16>
    %cst_9 = arith.constant dense<0.000000e+00> : vector<16x128xf32>
    %18 = tpu.matmul %16, %17, %cst_9 {dimension_numbers = #tpu.dot_dimension_numbers<[1], [0], [0], [1], [0, 0, 1, 1], [], []>} : vector<16x10xbf16>, vector<10x128xbf16>, vector<16x128xf32> -> vector<16x128xf32>
    %c0_10 = arith.constant 0 : index
    %c0_11 = arith.constant 0 : index
    %19 = vector.load %arg5[%c0_10, %c0_11] : memref<1x128xf32, #tpu.memory_space<vmem>>, vector<1x128xf32>
    %20 = vector.broadcast %19 : vector<1x128xf32> to vector<16x128xf32>
    %21 = arith.addf %18, %20 : vector<16x128xf32>
    %c0_12 = arith.constant 0 : index
    %c0_13 = arith.constant 0 : index
    %22 = vector.load %arg6[%c0_12, %c0_13] : memref<16x128xbf16, #tpu.memory_space<vmem>>, vector<16x128xbf16>
    %cst_14 = arith.constant dense<0.000000e+00> : vector<16x128xf32>
    %23 = tpu.matmul %0, %22, %cst_14 {dimension_numbers = #tpu.dot_dimension_numbers<[1], [0], [0], [1], [0, 0, 1, 1], [], []>} : vector<16x16xbf16>, vector<16x128xbf16>, vector<16x128xf32> -> vector<16x128xf32>
    %cst_15 = arith.constant 1.000000e+00 : f32
    %24 = vector.broadcast %cst_15 : f32 to vector<16x128xf32>
    %25 = arith.subf %23, %24 : vector<16x128xf32>
    %26 = arith.mulf %23, %25 : vector<16x128xf32>
    %cst_16 = arith.constant 5.000000e-01 : f32
    %27 = vector.broadcast %cst_16 : f32 to vector<16x128xf32>
    %28 = arith.mulf %26, %27 : vector<16x128xf32>
    %29 = arith.mulf %21, %28 : vector<16x128xf32>
    %c0_17 = arith.constant 0 : index
    %c0_18 = arith.constant 0 : index
    %30 = vector.load %arg7[%c0_17, %c0_18] : memref<16x128xf32, #tpu.memory_space<vmem>>, vector<16x128xf32>
    tpu.vector_store %arg7[%c0_17, %c0_18], %29 {strides = array<i32>} : memref<16x128xf32, #tpu.memory_space<vmem>>, vector<16x128xf32>,
    return
  }
  func.func @transform_0(%arg0: i32) -> (i32, i32) {
    %c0_i32 = arith.constant 0 : i32
    %c0_i32_0 = arith.constant 0 : i32
    return %arg0, %c0_i32 : i32, i32
  }
  func.func @transform_1(%arg0: i32) -> (i32, i32) {
    %c0_i32 = arith.constant 0 : i32
    %c0_i32_0 = arith.constant 0 : i32
    %c0_i32_1 = arith.constant 0 : i32
    return %c0_i32, %c0_i32_0 : i32, i32
  }
  func.func @transform_2(%arg0: i32) -> (i32, i32) {
    %c0_i32 = arith.constant 0 : i32
    %c0_i32_0 = arith.constant 0 : i32
    %c0_i32_1 = arith.constant 0 : i32
    return %c0_i32, %c0_i32_0 : i32, i32
  }
  func.func @transform_3(%arg0: i32) -> (i32, i32) {
    %c0_i32 = arith.constant 0 : i32
    %c0_i32_0 = arith.constant 0 : i32
    %c0_i32_1 = arith.constant 0 : i32
    return %c0_i32, %c0_i32_0 : i32, i32
  }
  func.func @transform_4(%arg0: i32) -> (i32, i32) {
    %c0_i32 = arith.constant 0 : i32
    %c0_i32_0 = arith.constant 0 : i32
    %c0_i32_1 = arith.constant 0 : i32
    return %c0_i32, %c0_i32_0 : i32, i32
  }
  func.func @transform_5(%arg0: i32) -> (i32, i32) {
    %c0_i32 = arith.constant 0 : i32
    %c0_i32_0 = arith.constant 0 : i32
    %c0_i32_1 = arith.constant 0 : i32
    return %c0_i32, %c0_i32_0 : i32, i32
  }
  func.func @transform_6(%arg0: i32) -> (i32, i32) {
    %c0_i32 = arith.constant 0 : i32
    %c0_i32_0 = arith.constant 0 : i32
    return %arg0, %c0_i32 : i32, i32
  }
}

module attributes {stable_mosaic.version = 11 : i64} {
  func.func @attention_net_kernel(%arg0: i32, %arg1: memref<16x16xbf16, #tpu.memory_space<vmem>>, %arg2: memref<16x10xbf16, #tpu.memory_space<vmem>>, %arg3: memref<1x10xf32, #tpu.memory_space<vmem>>, %arg4: memref<10x128xbf16, #tpu.memory_space<vmem>>, %arg5: memref<1x128xf32, #tpu.memory_space<vmem>>, %arg6: memref<16x128xbf16, #tpu.memory_space<vmem>>, %arg7: memref<16x128xf32, #tpu.memory_space<vmem>>) attributes {dimension_semantics = [#tpu.dimension_semantics<parallel>], iteration_bounds = array<i64: 1>, scalar_prefetch = 0 : i64, scratch_operands = 0 : i64, tpu.core_type = #tpu.core_type<tc>, window_params = [{transform_indices = @transform_0, window_bounds = array<i64: 16, 16>}, {pipeline_mode = #tpu.pipeline_mode<synchronous>, transform_indices = @transform_1, window_bounds = array<i64: 16, 10>}, {pipeline_mode = #tpu.pipeline_mode<synchronous>, transform_indices = @transform_2, window_bounds = array<i64: 1, 10>}, {pipeline_mode = #tpu.pipeline_mode<synchronous>, transform_indices = @transform_3, window_bounds = array<i64: 10, 128>}, {pipeline_mode = #tpu.pipeline_mode<synchronous>, transform_indices = @transform_4, window_bounds = array<i64: 1, 128>}, {pipeline_mode = #tpu.pipeline_mode<synchronous>, transform_indices = @transform_5, window_bounds = array<i64: 16, 128>}, {transform_indices = @transform_6, window_bounds = array<i64: 16, 128>}]} {
    %c0 = arith.constant 0 : index
    %c0_0 = arith.constant 0 : index
    %0 = vector.load %arg1[%c0, %c0_0] : memref<16x16xbf16, #tpu.memory_space<vmem>>, vector<16x16xbf16>
    %c0_1 = arith.constant 0 : index
    %c0_2 = arith.constant 0 : index
    %1 = vector.load %arg2[%c0_1, %c0_2] : memref<16x10xbf16, #tpu.memory_space<vmem>>, vector<16x10xbf16>
    %cst = arith.constant dense<0.000000e+00> : vector<16x10xf32>
    %2 = tpu.matmul %0, %1, %cst {dimension_numbers = #tpu.dot_dimension_numbers<[1], [0], [0], [1], [0, 0, 1, 1], [], []>} : vector<16x16xbf16>, vector<16x10xbf16>, vector<16x10xf32> -> vector<16x10xf32>
    %c0_3 = arith.constant 0 : index
    %c0_4 = arith.constant 0 : index
    %3 = vector.load %arg3[%c0_3, %c0_4] : memref<1x10xf32, #tpu.memory_space<vmem>>, vector<1x10xf32>
    %4 = vector.broadcast %3 : vector<1x10xf32> to vector<16x10xf32>
    %5 = arith.addf %2, %4 : vector<16x10xf32>
    %cst_5 = arith.constant dense<0xFF800000> : vector<16xf32>
    %6 = vector.multi_reduction <maximumf>, %5, %cst_5 [1] : vector<16x10xf32> to vector<16xf32>
    %7 = vector.shape_cast %6 : vector<16xf32> to vector<16x1xf32>
    %8 = vector.broadcast %7 : vector<16x1xf32> to vector<16x10xf32>
    %9 = arith.subf %5, %8 : vector<16x10xf32>
    %10 = math.exp %9 : vector<16x10xf32>
    %cst_6 = arith.constant dense<0.000000e+00> : vector<16xf32>
    %11 = vector.multi_reduction <add>, %10, %cst_6 [1] : vector<16x10xf32> to vector<16xf32>
    %12 = vector.shape_cast %11 : vector<16xf32> to vector<16x1xf32>
    %13 = tpu.reciprocal %12 {approx = true} : vector<16x1xf32> -> vector<16x1xf32>
    %14 = vector.broadcast %13 : vector<16x1xf32> to vector<16x10xf32>
    %15 = arith.mulf %10, %14 : vector<16x10xf32>
    %16 = arith.truncf %15 : vector<16x10xf32> to vector<16x10xbf16>
    %c0_7 = arith.constant 0 : index
    %c0_8 = arith.constant 0 : index
    %17 = vector.load %arg4[%c0_7, %c0_8] : memref<10x128xbf16, #tpu.memory_space<vmem>>, vector<10x128xbf16>
    %cst_9 = arith.constant dense<0.000000e+00> : vector<16x128xf32>
    %18 = tpu.matmul %16, %17, %cst_9 {dimension_numbers = #tpu.dot_dimension_numbers<[1], [0], [0], [1], [0, 0, 1, 1], [], []>} : vector<16x10xbf16>, vector<10x128xbf16>, vector<16x128xf32> -> vector<16x128xf32>
    %c0_10 = arith.constant 0 : index
    %c0_11 = arith.constant 0 : index
    %19 = vector.load %arg5[%c0_10, %c0_11] : memref<1x128xf32, #tpu.memory_space<vmem>>, vector<1x128xf32>
    %20 = vector.broadcast %19 : vector<1x128xf32> to vector<16x128xf32>
    %21 = arith.addf %18, %20 : vector<16x128xf32>
    %c0_12 = arith.constant 0 : index
    %c0_13 = arith.constant 0 : index
    %22 = vector.load %arg6[%c0_12, %c0_13] : memref<16x128xbf16, #tpu.memory_space<vmem>>, vector<16x128xbf16>
    %cst_14 = arith.constant dense<0.000000e+00> : vector<16x128xf32>
    %23 = tpu.matmul %0, %22, %cst_14 {dimension_numbers = #tpu.dot_dimension_numbers<[1], [0], [0], [1], [0, 0, 1, 1], [], []>} : vector<16x16xbf16>, vector<16x128xbf16>, vector<16x128xf32> -> vector<16x128xf32>
    %cst_15 = arith.constant 1.000000e+00 : f32
    %24 = vector.broadcast %cst_15 : f32 to vector<16x128xf32>
    %25 = arith.subf %23, %24 : vector<16x128xf32>
    %26 = arith.mulf %23, %25 : vector<16x128xf32>
    %cst_16 = arith.constant 5.000000e-01 : f32
    %27 = vector.broadcast %cst_16 : f32 to vector<16x128xf32>
    %28 = arith.mulf %26, %27 : vector<16x128xf32>
    %29 = arith.mulf %21, %28 : vector<16x128xf32>
    %c0_17 = arith.constant 0 : index
    %c0_18 = arith.constant 0 : index
    %30 = vector.load %arg7[%c0_17, %c0_18] : memref<16x128xf32, #tpu.memory_space<vmem>>, vector<16x128xf32>
    tpu.vector_store %arg7[%c0_17, %c0_18], %29 {strides = array<i32>} : memref<16x128xf32, #tpu.memory_space<vmem>>, vector<16x128xf32>,
    return
  }
  func.func @transform_0(%arg0: i32) -> (i32, i32) {
    %c0_i32 = arith.constant 0 : i32
    %c0_i32_0 = arith.constant 0 : i32
    return %arg0, %c0_i32 : i32, i32
  }
  func.func @transform_1(%arg0: i32) -> (i32, i32) {
    %c0_i32 = arith.constant 0 : i32
    %c0_i32_0 = arith.constant 0 : i32
    %c0_i32_1 = arith.constant 0 : i32
    return %c0_i32, %c0_i32_0 : i32, i32
  }
  func.func @transform_2(%arg0: i32) -> (i32, i32) {
    %c0_i32 = arith.constant 0 : i32
    %c0_i32_0 = arith.constant 0 : i32
    %c0_i32_1 = arith.constant 0 : i32
    return %c0_i32, %c0_i32_0 : i32, i32
  }
  func.func @transform_3(%arg0: i32) -> (i32, i32) {
    %c0_i32 = arith.constant 0 : i32
    %c0_i32_0 = arith.constant 0 : i32
    %c0_i32_1 = arith.constant 0 : i32
    return %c0_i32, %c0_i32_0 : i32, i32
  }
  func.func @transform_4(%arg0: i32) -> (i32, i32) {
    %c0_i32 = arith.constant 0 : i32
    %c0_i32_0 = arith.constant 0 : i32
    %c0_i32_1 = arith.constant 0 : i32
    return %c0_i32, %c0_i32_0 : i32, i32
  }
  func.func @transform_5(%arg0: i32) -> (i32, i32) {
    %c0_i32 = arith.constant 0 : i32
    %c0_i32_0 = arith.constant 0 : i32
    %c0_i32_1 = arith.constant 0 : i32
    return %c0_i32, %c0_i32_0 : i32, i32
  }
  func.func @transform_6(%arg0: i32) -> (i32, i32) {
    %c0_i32 = arith.constant 0 : i32
    %c0_i32_0 = arith.constant 0 : i32
    return %arg0, %c0_i32 : i32, i32
  }
}

</mosaic_0001>

<bundles_post_ra>
// kernel: tpu_custom_call.1
= control target key start
LH: loop header
LB: loop body
LE: loop exit
PB: predicated region body
PF: predicated region fallthrough
CT: control target
= control target key end

     0   :  { %11 = vsyncpa [#allocation3], 0  ;;  %s510_s0 = inlined_call_operand.hbm [shape: bf16[16,16], index: 0, kind: input, shape index: {}]   ;;  %s511_s1 = inlined_call_operand.hbm [shape: bf16[16,10], index: 1, kind: input, shape index: {}]   ;;  %s512_s2 = inlined_call_operand.vmem [shape: f32[1,10], index: 2, kind: input, shape index: {}]   ;;  %s513_s3 = inlined_call_operand.vmem [shape: bf16[10,128], index: 3, kind: input, shape index: {}]   ;;  %s514_s4 = inlined_call_operand.vmem [shape: f32[1,128], index: 4, kind: input, shape index: {}]   ;;  %s515_s5 = inlined_call_operand.vmem [shape: bf16[16,128], index: 5, kind: input, shape index: {}]   ;;  %s516_s6 = inlined_call_operand.hbm [shape: f32[16,128], index: 6, kind: output, shape index: {}]  }
   0x1   :  { %12 = vsyncpa [#allocation6], 0 }
   0x2   :  { %13 = vsyncpa [#allocation4], 0  ;;  %s411_s21 = smov [#allocation2]   ;;  %s339_s25 = scalar_lea.hbm %s510_s0, 128 }
   0x3   :  { %s19_s22 = sshll.u32 %s411_s21, 4  ;;  %p340_p0 = scmp.ne.s32.totalorder %s510_s0, %s339_s25  ;;  %s20_s22 = int_to_ptr.vmem [resolvable:$true] %s19_s22 }
   0x4   :  { %p343_p1 = scmp.lt.u32.totalorder %s339_s25, %s510_s0 }
   0x6   :  { %p345_p2 = pnand %p343_p1, %p340_p0 }
   0x8   :  { %348 = shalt.err (!%p345_p2)
}
   0x9   :  { %s349_s30 = scalar_lea.vmem %s20_s22, 128  ;;  %p354_p4 = scmp.lt.s32.totalorder %s20_s22, %s20_s22 }
   0xa   :  { %p350_p3 = scmp.ne.s32.totalorder %s20_s22, %s349_s30  ;;  %p355_p5 = scmp.lt.s32.totalorder %s349_s30, %s349_s30 }
   0xc   :  { %p356_p6 = por %p355_p5, %p354_p4 }
   0xe   :  { %p357_p7 = pnand %p356_p6, %p350_p3 }
  0x10   :  { %360 = shalt.err (!%p357_p7)
}
  0x11   :  { %s412_s7 = smov 64   ;;  %s413_s8 = smov 4  }
  0x12   :  { %25 = dma.hbm_to_vmem [thread:$0]  %s510_s0, 128, %s20_s22, [#allocation3], %s412_s7, %s412_s7, %s413_s8  }
  0x13   :  { %s414_s11 = smov [#allocation5]   ;;  %s361_s15 = scalar_lea.hbm %s511_s1, 128 }
  0x14   :  { %s31_s12 = sshll.u32 %s414_s11, 4  ;;  %p362_p8 = scmp.ne.s32.totalorder %s511_s1, %s361_s15  ;;  %s32_s12 = int_to_ptr.vmem [resolvable:$true] %s31_s12 }
  0x15   :  { %p365_p9 = scmp.lt.u32.totalorder %s361_s15, %s511_s1 }
  0x17   :  { %p367_p10 = pnand %p365_p9, %p362_p8 }
  0x19   :  { %370 = shalt.err (!%p367_p10)
}
  0x1a   :  { %s371_s20 = scalar_lea.vmem %s32_s12, 128  ;;  %p376_p12 = scmp.lt.s32.totalorder %s32_s12, %s32_s12 }
  0x1b   :  { %p372_p11 = scmp.ne.s32.totalorder %s32_s12, %s371_s20  ;;  %p377_p13 = scmp.lt.s32.totalorder %s371_s20, %s371_s20 }
  0x1d   :  { %p378_p0 = por %p377_p13, %p376_p12 }
  0x1f   :  { %p379_p1 = pnand %p378_p0, %p372_p11 }
  0x21   :  { %382 = shalt.err (!%p379_p1)
}
  0x22   :  { %37 = dma.hbm_to_vmem [thread:$0]  %s511_s1, 128, %s32_s12, [#allocation6], %s412_s7, %s412_s7, %s413_s8  }
  0x23   :  { %405 = dma.done.wait [#allocation3], 128  }
  0x24   :  { %406 = vsyncadd [#allocation3], 4294967168 }
  0x25   :  { %407 = dma.done.wait [#allocation6], 128  }
  0x26   :  { %408 = vsyncadd [#allocation6], 4294967168  ;;  %v415_v0 = vmov 0.0   ;;  %vm416_vm0 = vmmov 0   ;;  %v327_v1 = vld [vmem:[#allocation5] sm:$0xff]   ;;  %v328_v2 = vld [vmem:[#allocation2] sm:$0xff]  }
  0x27   :  { %300 = vmatprep.subr.bf16.mxu0 %v415_v0  ;;  %302 = vmatprep.mubr.msk.bf16.mxu0 %vm416_vm0, %v415_v0  ;;  %vm75_vm1 = vcmask 130048   ;;  %v283_v3 = vld [vmem:[%s512_s2] ss:$0 sm:$0xff]  ;;  %vm120_vm2 = vcmask 80896   ;;  %vm161_vm3 = vcmask 1044480   ;;  %s417_s26 = smov [#allocation7]  }
  0x28   :  { %306 = vmatprep.subr.bf16.mxu1 %v415_v0  ;;  %308 = vmatprep.mubr.msk.bf16.mxu1 %vm416_vm0, %v415_v0  ;;  %v329_v22 = vld [vmem:[%s515_s5] sm:$0xff]   ;;  %s270_s27 = sshll.u32 %s417_s26, 4  ;;  %s271_s27 = int_to_ptr.vmem [resolvable:$true] %s270_s27 }
  0x29   :  { %301 = vmatpush3.bf16.msra.mxu0 %v327_v1  ;;  %v330_v23 = vld [vmem:[%s513_s3] sm:$0x1f]   ;;  %s383_s28 = scalar_lea.vmem %s271_s27, 256  ;;  %p388_p3 = scmp.lt.s32.totalorder %s271_s27, %s271_s27 }
  0x2a   :  { %312 = vmatprep.subr.bf16.mxu0 %v415_v0  ;;  %v163_v24 = vsel %vm161_vm3, %v330_v23, 0  ;;  %v287_v39 = vld [vmem:[%s514_s4] ss:$0 sm:$0xff]  ;;  %p384_p2 = scmp.ne.s32.totalorder %s271_s27, %s383_s28  ;;  %p389_p4 = scmp.lt.s32.totalorder %s383_s28, %s383_s28 }
  0x2b   :  { %307 = vmatpush3.bf16.msra.mxu1 %v163_v24 }
  0x2c   :  { %303 = vmatmul.mubr.msk.bf16.vlgmr.msra.gmra.mrb[0].mxu0 %vm75_vm1, %v328_v2  ;;  %p390_p5 = por %p389_p4, %p388_p3 }
  0x2d   :  { %314 = vmatprep.mubr.msk.bf16.mxu0 %vm416_vm0, %v415_v0  ;;  %313 = vmatpush3.bf16.msra.mxu0 %v329_v22 }
  0x2e   :  { %p391_p6 = pnand %p390_p5, %p384_p2 }
  0x34   :  { %315 = vmatmul.mubr.msk.bf16.vlgmr.msra.gmra.mrb[4].mxu0 %vm75_vm1, %v328_v2 }
  0xff   :  { %v113_v4 = vpop.f32.mrb[0].mxu0 }
 0x100   :  { %v114_v5 = vadd.f32 %v283_v3, %v113_v4  ;;  %v304_v6 = vpop.f32.mrb[1].mxu0 }
 0x101   :  { %v116_v7 = vpop.f32.mrb[2].mxu0 }
 0x102   :  { %v117_v8 = vadd.f32 %v283_v3, %v116_v7  ;;  %v305_v9 = vpop.f32.mrb[3].mxu0  ;;  %v121_v10 = vsel %vm120_vm2, %v114_v5, -inf }
 0x103   :  { %122 = vmax.xlane.f32.xlu0 %v121_v10 }
 0x104   :  { %v124_v11 = vsel %vm120_vm2, %v117_v8, -inf }
 0x107   :  { %125 = vmax.xlane.f32.xlu0 %v124_v11  ;;  %v248_v32 = vpop.f32.mrb[4].mxu0 }
 0x108   :  { %v316_v33 = vpop.f32.mrb[5].mxu0  ;;  %v292_v36 = vadd.f32 -1.0, %v248_v32 }
 0x109   :  { %v251_v34 = vpop.f32.mrb[6].mxu0 }
 0x10a   :  { %v317_v35 = vpop.f32.mrb[7].mxu0  ;;  %v293_v37 = vadd.f32 -1.0, %v251_v34  ;;  %v257_v38 = vmul.f32 %v292_v36, %v248_v32 }
 0x10c   :  { %v258_v40 = vmul.f32 %v293_v37, %v251_v34  ;;  %v259_v42 = vmul.f32 0.5, %v257_v38 }
 0x10e   :  { %v260_v46 = vmul.f32 0.5, %v258_v40 }
 0x190   :  { %v123_v12 = vpop.xlane.xlu0 %122 }
 0x191   :  { %v127_v13 = vsub.f32 %v114_v5, %v123_v12 }
 0x193   :  { %v129_v14 = vmul.f32 1.442695, %v127_v13 }
 0x194   :  { %v126_v15 = vpop.xlane.xlu0 %125 }
 0x195   :  { %331 = vpow2.f32 %v129_v14  ;;  %v128_v16 = vsub.f32 %v117_v8, %v126_v15 }
 0x197   :  { %v131_v17 = vmul.f32 1.442695, %v128_v16 }
 0x199   :  { %333 = vpow2.f32 %v131_v17 }
 0x19f   :  { %v332_v18 = vpop.eup %331 }
 0x1a0   :  { %v133_v19 = vsel %vm120_vm2, %v332_v18, 0.0 }
 0x1a1   :  { %134 = vadd.xlane.f32.xlu1 %v133_v19 }
 0x1a3   :  { %v334_v20 = vpop.eup %333 }
 0x1a4   :  { %v136_v21 = vsel %vm120_vm2, %v334_v20, 0.0 }
 0x1a5   :  { %137 = vadd.xlane.f32.xlu1 %v136_v21 }
 0x22e   :  { %v135_v25 = vpop.xlane.xlu1 %134 }
 0x22f   :  { %335 = vrcp.f32 %v135_v25 }
 0x232   :  { %v138_v26 = vpop.xlane.xlu1 %137 }
 0x233   :  { %337 = vrcp.f32 %v138_v26 }
 0x239   :  { %v336_v27 = vpop.eup %335 }
 0x23a   :  { %v141_v29 = vmul.f32 %v336_v27, %v332_v18 }
 0x23d   :  { %v338_v28 = vpop.eup %337 }
 0x23e   :  { %v142_v30 = vmul.f32 %v338_v28, %v334_v20 }
 0x240   :  { %v143_v31 = vpack.c.bf16 %v142_v30, %v141_v29 }
 0x242   :  { %309 = vmatmul.mubr.msk.bf16.vlgmr.msra.gmra.mrb[0].mxu1 %vm120_vm2, %v143_v31 }
 0x315   :  { %v199_v41 = vpop.f32.mrb[0].mxu1 }
 0x316   :  { %v200_v43 = vadd.f32 %v287_v39, %v199_v41  ;;  %v310_v44 = vpop.f32.mrb[1].mxu1 }
 0x317   :  { %v202_v45 = vpop.f32.mrb[2].mxu1 }
 0x318   :  { %v261_v47 = vmul.f32 %v259_v42, %v200_v43  ;;  %v203_v48 = vadd.f32 %v287_v39, %v202_v45  ;;  %v311_v49 = vpop.f32.mrb[3].mxu1 }
 0x31a   :  { %263 = vst [vmem:[#allocation7] sm:$0xff] %v261_v47  ;;  %v262_v50 = vmul.f32 %v260_v46, %v203_v48 }
 0x31c   :  { %264 = vst [vmem:[#allocation7 + $0x8] sm:$0xff] %v262_v50 }
 0x31d   :  { %394 = shalt.err (!%p391_p6)
}
 0x31e   :  { %s395_s30 = scalar_lea.hbm %s516_s6, 256 }
 0x31f   :  { %p396_p7 = scmp.ne.s32.totalorder %s516_s6, %s395_s30  ;;  %p399_p8 = scmp.lt.u32.totalorder %s395_s30, %s516_s6 }
 0x321   :  { %p401_p9 = pnand %p399_p8, %p396_p7 }
 0x323   :  { %404 = shalt.err (!%p401_p9)
}
 0x324   :  { %s418_s11 = smov 128   ;;  %s419_s12 = smov 8  }
 0x325   :  { %276 = dma.vmem_to_hbm [thread:$0]  %s271_s27, 256, %s516_s6, [#allocation4], %s418_s11, %s418_s11, %s419_s12  }
 0x326   :  { %409 = dma.done.wait [#allocation4], 256  }
 0x327   :  { %410 = vsyncadd [#allocation4], 4294967040 }
 0x328   :  { %280 = vsyncpa [#allocation3], 1 }
 0x329   :  { %281 = vsyncpa [#allocation6], 1 }
 0x32a   :  { %282 = vsyncpa [#allocation4], 1 }

// kernel: tpu_custom_call.1
= control target key start
LH: loop header
LB: loop body
LE: loop exit
PB: predicated region body
PF: predicated region fallthrough
CT: control target
= control target key end

     0   :  { %11 = vsyncpa [#allocation3], 0  ;;  %s510_s0 = inlined_call_operand.hbm [shape: bf16[16,16], index: 0, kind: input, shape index: {}]   ;;  %s511_s1 = inlined_call_operand.hbm [shape: bf16[16,10], index: 1, kind: input, shape index: {}]   ;;  %s512_s2 = inlined_call_operand.vmem [shape: f32[1,10], index: 2, kind: input, shape index: {}]   ;;  %s513_s3 = inlined_call_operand.vmem [shape: bf16[10,128], index: 3, kind: input, shape index: {}]   ;;  %s514_s4 = inlined_call_operand.vmem [shape: f32[1,128], index: 4, kind: input, shape index: {}]   ;;  %s515_s5 = inlined_call_operand.vmem [shape: bf16[16,128], index: 5, kind: input, shape index: {}]   ;;  %s516_s6 = inlined_call_operand.hbm [shape: f32[16,128], index: 6, kind: output, shape index: {}]  }
   0x1   :  { %12 = vsyncpa [#allocation6], 0 }
   0x2   :  { %13 = vsyncpa [#allocation4], 0  ;;  %s411_s21 = smov [#allocation2]   ;;  %s339_s25 = scalar_lea.hbm %s510_s0, 128 }
   0x3   :  { %s19_s22 = sshll.u32 %s411_s21, 4  ;;  %p340_p0 = scmp.ne.s32.totalorder %s510_s0, %s339_s25  ;;  %s20_s22 = int_to_ptr.vmem [resolvable:$true] %s19_s22 }
   0x4   :  { %p343_p1 = scmp.lt.u32.totalorder %s339_s25, %s510_s0 }
   0x6   :  { %p345_p2 = pnand %p343_p1, %p340_p0 }
   0x8   :  { %348 = shalt.err (!%p345_p2)
}
   0x9   :  { %s349_s30 = scalar_lea.vmem %s20_s22, 128  ;;  %p354_p4 = scmp.lt.s32.totalorder %s20_s22, %s20_s22 }
   0xa   :  { %p350_p3 = scmp.ne.s32.totalorder %s20_s22, %s349_s30  ;;  %p355_p5 = scmp.lt.s32.totalorder %s349_s30, %s349_s30 }
   0xc   :  { %p356_p6 = por %p355_p5, %p354_p4 }
   0xe   :  { %p357_p7 = pnand %p356_p6, %p350_p3 }
  0x10   :  { %360 = shalt.err (!%p357_p7)
}
  0x11   :  { %s412_s7 = smov 64   ;;  %s413_s8 = smov 4  }
  0x12   :  { %25 = dma.hbm_to_vmem [thread:$0]  %s510_s0, 128, %s20_s22, [#allocation3], %s412_s7, %s412_s7, %s413_s8  }
  0x13   :  { %s414_s11 = smov [#allocation5]   ;;  %s361_s15 = scalar_lea.hbm %s511_s1, 128 }
  0x14   :  { %s31_s12 = sshll.u32 %s414_s11, 4  ;;  %p362_p8 = scmp.ne.s32.totalorder %s511_s1, %s361_s15  ;;  %s32_s12 = int_to_ptr.vmem [resolvable:$true] %s31_s12 }
  0x15   :  { %p365_p9 = scmp.lt.u32.totalorder %s361_s15, %s511_s1 }
  0x17   :  { %p367_p10 = pnand %p365_p9, %p362_p8 }
  0x19   :  { %370 = shalt.err (!%p367_p10)
}
  0x1a   :  { %s371_s20 = scalar_lea.vmem %s32_s12, 128  ;;  %p376_p12 = scmp.lt.s32.totalorder %s32_s12, %s32_s12 }
  0x1b   :  { %p372_p11 = scmp.ne.s32.totalorder %s32_s12, %s371_s20  ;;  %p377_p13 = scmp.lt.s32.totalorder %s371_s20, %s371_s20 }
  0x1d   :  { %p378_p0 = por %p377_p13, %p376_p12 }
  0x1f   :  { %p379_p1 = pnand %p378_p0, %p372_p11 }
  0x21   :  { %382 = shalt.err (!%p379_p1)
}
  0x22   :  { %37 = dma.hbm_to_vmem [thread:$0]  %s511_s1, 128, %s32_s12, [#allocation6], %s412_s7, %s412_s7, %s413_s8  }
  0x23   :  { %405 = dma.done.wait [#allocation3], 128  }
  0x24   :  { %406 = vsyncadd [#allocation3], 4294967168 }
  0x25   :  { %407 = dma.done.wait [#allocation6], 128  }
  0x26   :  { %408 = vsyncadd [#allocation6], 4294967168  ;;  %v415_v0 = vmov 0.0   ;;  %vm416_vm0 = vmmov 0   ;;  %v327_v1 = vld [vmem:[#allocation5] sm:$0xff]   ;;  %v328_v2 = vld [vmem:[#allocation2] sm:$0xff]  }
  0x27   :  { %300 = vmatprep.subr.bf16.mxu0 %v415_v0  ;;  %302 = vmatprep.mubr.msk.bf16.mxu0 %vm416_vm0, %v415_v0  ;;  %vm75_vm1 = vcmask 130048   ;;  %v283_v3 = vld [vmem:[%s512_s2] ss:$0 sm:$0xff]  ;;  %vm120_vm2 = vcmask 80896   ;;  %vm161_vm3 = vcmask 1044480   ;;  %s417_s26 = smov [#allocation7]  }
  0x28   :  { %306 = vmatprep.subr.bf16.mxu1 %v415_v0  ;;  %308 = vmatprep.mubr.msk.bf16.mxu1 %vm416_vm0, %v415_v0  ;;  %v329_v22 = vld [vmem:[%s515_s5] sm:$0xff]   ;;  %s270_s27 = sshll.u32 %s417_s26, 4  ;;  %s271_s27 = int_to_ptr.vmem [resolvable:$true] %s270_s27 }
  0x29   :  { %301 = vmatpush3.bf16.msra.mxu0 %v327_v1  ;;  %v330_v23 = vld [vmem:[%s513_s3] sm:$0x1f]   ;;  %s383_s28 = scalar_lea.vmem %s271_s27, 256  ;;  %p388_p3 = scmp.lt.s32.totalorder %s271_s27, %s271_s27 }
  0x2a   :  { %312 = vmatprep.subr.bf16.mxu0 %v415_v0  ;;  %v163_v24 = vsel %vm161_vm3, %v330_v23, 0  ;;  %v287_v39 = vld [vmem:[%s514_s4] ss:$0 sm:$0xff]  ;;  %p384_p2 = scmp.ne.s32.totalorder %s271_s27, %s383_s28  ;;  %p389_p4 = scmp.lt.s32.totalorder %s383_s28, %s383_s28 }
  0x2b   :  { %307 = vmatpush3.bf16.msra.mxu1 %v163_v24 }
  0x2c   :  { %303 = vmatmul.mubr.msk.bf16.vlgmr.msra.gmra.mrb[0].mxu0 %vm75_vm1, %v328_v2  ;;  %p390_p5 = por %p389_p4, %p388_p3 }
  0x2d   :  { %314 = vmatprep.mubr.msk.bf16.mxu0 %vm416_vm0, %v415_v0  ;;  %313 = vmatpush3.bf16.msra.mxu0 %v329_v22 }
  0x2e   :  { %p391_p6 = pnand %p390_p5, %p384_p2 }
  0x34   :  { %315 = vmatmul.mubr.msk.bf16.vlgmr.msra.gmra.mrb[4].mxu0 %vm75_vm1, %v328_v2 }
  0xff   :  { %v113_v4 = vpop.f32.mrb[0].mxu0 }
 0x100   :  { %v114_v5 = vadd.f32 %v283_v3, %v113_v4  ;;  %v304_v6 = vpop.f32.mrb[1].mxu0 }
 0x101   :  { %v116_v7 = vpop.f32.mrb[2].mxu0 }
 0x102   :  { %v117_v8 = vadd.f32 %v283_v3, %v116_v7  ;;  %v305_v9 = vpop.f32.mrb[3].mxu0  ;;  %v121_v10 = vsel %vm120_vm2, %v114_v5, -inf }
 0x103   :  { %122 = vmax.xlane.f32.xlu0 %v121_v10 }
 0x104   :  { %v124_v11 = vsel %vm120_vm2, %v117_v8, -inf }
 0x107   :  { %125 = vmax.xlane.f32.xlu0 %v124_v11  ;;  %v248_v32 = vpop.f32.mrb[4].mxu0 }
 0x108   :  { %v316_v33 = vpop.f32.mrb[5].mxu0  ;;  %v292_v36 = vadd.f32 -1.0, %v248_v32 }
 0x109   :  { %v251_v34 = vpop.f32.mrb[6].mxu0 }
 0x10a   :  { %v317_v35 = vpop.f32.mrb[7].mxu0  ;;  %v293_v37 = vadd.f32 -1.0, %v251_v34  ;;  %v257_v38 = vmul.f32 %v292_v36, %v248_v32 }
 0x10c   :  { %v258_v40 = vmul.f32 %v293_v37, %v251_v34  ;;  %v259_v42 = vmul.f32 0.5, %v257_v38 }
 0x10e   :  { %v260_v46 = vmul.f32 0.5, %v258_v40 }
 0x190   :  { %v123_v12 = vpop.xlane.xlu0 %122 }
 0x191   :  { %v127_v13 = vsub.f32 %v114_v5, %v123_v12 }
 0x193   :  { %v129_v14 = vmul.f32 1.442695, %v127_v13 }
 0x194   :  { %v126_v15 = vpop.xlane.xlu0 %125 }
 0x195   :  { %331 = vpow2.f32 %v129_v14  ;;  %v128_v16 = vsub.f32 %v117_v8, %v126_v15 }
 0x197   :  { %v131_v17 = vmul.f32 1.442695, %v128_v16 }
 0x199   :  { %333 = vpow2.f32 %v131_v17 }
 0x19f   :  { %v332_v18 = vpop.eup %331 }
 0x1a0   :  { %v133_v19 = vsel %vm120_vm2, %v332_v18, 0.0 }
 0x1a1   :  { %134 = vadd.xlane.f32.xlu1 %v133_v19 }
 0x1a3   :  { %v334_v20 = vpop.eup %333 }
 0x1a4   :  { %v136_v21 = vsel %vm120_vm2, %v334_v20, 0.0 }
 0x1a5   :  { %137 = vadd.xlane.f32.xlu1 %v136_v21 }
 0x22e   :  { %v135_v25 = vpop.xlane.xlu1 %134 }
 0x22f   :  { %335 = vrcp.f32 %v135_v25 }
 0x232   :  { %v138_v26 = vpop.xlane.xlu1 %137 }
 0x233   :  { %337 = vrcp.f32 %v138_v26 }
 0x239   :  { %v336_v27 = vpop.eup %335 }
 0x23a   :  { %v141_v29 = vmul.f32 %v336_v27, %v332_v18 }
 0x23d   :  { %v338_v28 = vpop.eup %337 }
 0x23e   :  { %v142_v30 = vmul.f32 %v338_v28, %v334_v20 }
 0x240   :  { %v143_v31 = vpack.c.bf16 %v142_v30, %v141_v29 }
 0x242   :  { %309 = vmatmul.mubr.msk.bf16.vlgmr.msra.gmra.mrb[0].mxu1 %vm120_vm2, %v143_v31 }
 0x315   :  { %v199_v41 = vpop.f32.mrb[0].mxu1 }
 0x316   :  { %v200_v43 = vadd.f32 %v287_v39, %v199_v41  ;;  %v310_v44 = vpop.f32.mrb[1].mxu1 }
 0x317   :  { %v202_v45 = vpop.f32.mrb[2].mxu1 }
 0x318   :  { %v261_v47 = vmul.f32 %v259_v42, %v200_v43  ;;  %v203_v48 = vadd.f32 %v287_v39, %v202_v45  ;;  %v311_v49 = vpop.f32.mrb[3].mxu1 }
 0x31a   :  { %263 = vst [vmem:[#allocation7] sm:$0xff] %v261_v47  ;;  %v262_v50 = vmul.f32 %v260_v46, %v203_v48 }
 0x31c   :  { %264 = vst [vmem:[#allocation7 + $0x8] sm:$0xff] %v262_v50 }
 0x31d   :  { %394 = shalt.err (!%p391_p6)
}
 0x31e   :  { %s395_s30 = scalar_lea.hbm %s516_s6, 256 }
 0x31f   :  { %p396_p7 = scmp.ne.s32.totalorder %s516_s6, %s395_s30  ;;  %p399_p8 = scmp.lt.u32.totalorder %s395_s30, %s516_s6 }
 0x321   :  { %p401_p9 = pnand %p399_p8, %p396_p7 }
 0x323   :  { %404 = shalt.err (!%p401_p9)
}
 0x324   :  { %s418_s11 = smov 128   ;;  %s419_s12 = smov 8  }
 0x325   :  { %276 = dma.vmem_to_hbm [thread:$0]  %s271_s27, 256, %s516_s6, [#allocation4], %s418_s11, %s418_s11, %s419_s12  }
 0x326   :  { %409 = dma.done.wait [#allocation4], 256  }
 0x327   :  { %410 = vsyncadd [#allocation4], 4294967040 }
 0x328   :  { %280 = vsyncpa [#allocation3], 1 }
 0x329   :  { %281 = vsyncpa [#allocation6], 1 }
 0x32a   :  { %282 = vsyncpa [#allocation4], 1 }

</bundles_post_ra>
